<compile_context>
chip_gen: v5e
topology: v5e:2x2
jax: 0.10.0
libtpu: 0.0.40
codegen_flags: <defaults>
</compile_context>

<pallas_src>
import jax
import jax.numpy as jnp
from jax.experimental import pallas as pl
from jax.experimental.pallas import tpu as pltpu

_LANE = 128
_SUBLANE = 8


def _round_up(x, m):
    return (x + m - 1) // m * m


def _mlp_kernel(x_ref, w1_ref, b1_ref, w2_ref, b2_ref, w3_ref, b3_ref, o_ref):
    # Layer 1: relu(x @ W1 + b1) -- bf16 MXU inputs, f32 accumulation.
    h = jnp.dot(x_ref[...], w1_ref[...], preferred_element_type=jnp.float32)
    h = jnp.maximum(h + b1_ref[...], 0.0)
    # Layer 2: relu(h @ W2 + b2)
    h = jnp.dot(h.astype(w2_ref.dtype), w2_ref[...],
                preferred_element_type=jnp.float32)
    h = jnp.maximum(h + b2_ref[...], 0.0)
    # Layer 3: relu(h @ W3 + b3) -- W3/b3 pre-padded to a lane-dense 128 width.
    h = jnp.dot(h.astype(w3_ref.dtype), w3_ref[...],
                preferred_element_type=jnp.float32)
    h = jnp.maximum(h + b3_ref[...], 0.0)
    o_ref[...] = h.astype(o_ref.dtype)


def mlp_with_conf(x, params, *, block_b=512):
    """x: [B, input_size] float32 (already flattened).

    Returns [B, output_size + 1] float32.
    block_b: batch tile size (512 keeps comfortable headroom under v7x's
    64 MiB VMEM even with double-buffering; v5e/v6e could go larger).
    """
    w1, b1, w2, b2, w3, b3 = params
    B, in_dim = x.shape
    out_dim = w3.shape[1]

    # Lane-dense padded output width (avoids masked vst.msk partial stores).
    out_pad = _round_up(out_dim, _LANE)

    # Batch tile: multiple of 8 sublanes; pad B so the grid divides evenly.
    tb = min(block_b, _round_up(B, _SUBLANE))
    b_pad = _round_up(B, tb)

    # bf16 streaming for x and weights; biases stay f32 (VPU math in f32).
    xp = jnp.zeros((b_pad, in_dim), jnp.bfloat16).at[:B].set(
        x.astype(jnp.bfloat16))
    w1b = w1.astype(jnp.bfloat16)
    w2b = w2.astype(jnp.bfloat16)
    w3b = jnp.zeros((w3.shape[0], out_pad), jnp.bfloat16).at[:, :out_dim].set(
        w3.astype(jnp.bfloat16))
    b3p = jnp.zeros((1, out_pad), jnp.float32).at[:, :out_dim].set(b3)

    # Weights / biases: full-array blocks, constant index_map -> VMEM-resident.
    const2 = lambda a: pl.BlockSpec(a.shape, lambda i: (0, 0))

    out = pl.pallas_call(
        _mlp_kernel,
        out_shape=jax.ShapeDtypeStruct((b_pad, out_pad), jnp.float32),
        grid=(b_pad // tb,),
        in_specs=[
            pl.BlockSpec((tb, in_dim), lambda i: (i, 0)),   # x: batch-tiled
            const2(w1b), const2(b1),
            const2(w2b), const2(b2),
            const2(w3b), const2(b3p),
        ],
        out_specs=pl.BlockSpec((tb, out_pad), lambda i: (i, 0)),
        compiler_params=pltpu.CompilerParams(
            dimension_semantics=("parallel",)),
    )(xp, w1b, b1, w2b, b2, w3b, b3p)

    # Drop batch padding and the lane padding of the last layer.
    return out[:B, :out_dim]


def init_params(key, input_size, output_size):
    """Deterministic synthetic parameters matching the PyTorch module's shapes.

    Weights stored as [in, out] (PyTorch weight transposed); biases as [1, out]
    so they broadcast over the batch tile inside the kernel.
    """
    ks = jax.random.split(key, 6)
    h = 64
    out = output_size + 1
    scale = 0.1
    w1 = scale * jax.random.normal(ks[0], (input_size, h), jnp.float32)
    b1 = scale * jax.random.normal(ks[1], (1, h), jnp.float32)
    w2 = scale * jax.random.normal(ks[2], (h, h), jnp.float32)
    b2 = scale * jax.random.normal(ks[3], (1, h), jnp.float32)
    w3 = scale * jax.random.normal(ks[4], (h, out), jnp.float32)
    b3 = scale * jax.random.normal(ks[5], (1, out), jnp.float32)
    return (w1, b1, w2, b2, w3, b3)


def reference_forward(x, params):
    """Pure-JAX reference mirroring the kernel's bf16-input / f32-accum math."""
    w1, b1, w2, b2, w3, b3 = params
    xb = x.astype(jnp.bfloat16)
    h = jnp.dot(xb, w1.astype(jnp.bfloat16),
                preferred_element_type=jnp.float32)
    h = jnp.maximum(h + b1, 0.0)
    h = jnp.dot(h.astype(jnp.bfloat16), w2.astype(jnp.bfloat16),
                preferred_element_type=jnp.float32)
    h = jnp.maximum(h + b2, 0.0)
    h = jnp.dot(h.astype(jnp.bfloat16), w3.astype(jnp.bfloat16),
                preferred_element_type=jnp.float32)
    h = jnp.maximum(h + b3, 0.0)
    return h


if __name__ == "__main__":
    key = jax.random.PRNGKey(0)
    k_x, k_p = jax.random.split(key)

    # Small example: batch=2, a 4x16 "image" per sample -> input_size = 64.
    batch = 2
    in_shape = (4, 16)            # flattened by x.view(B, -1) in the module
    input_size = in_shape[0] * in_shape[1]
    output_size = 9               # fc3 produces output_size + 1 = 10 features

    x_raw = jax.random.normal(k_x, (batch,) + in_shape, jnp.float32)
    x = x_raw.reshape(batch, -1)  # x.view(x.shape[0], -1)

    params = init_params(k_p, input_size, output_size)

    out = mlp_with_conf(x, params)
    out = jax.block_until_ready(out)

    ref = reference_forward(x, params)
    assert out.shape == (batch, output_size + 1), out.shape
    assert jnp.allclose(out, ref, atol=2e-3, rtol=2e-3), float(
        jnp.max(jnp.abs(out - ref)))

    print("KERNEL_OK")
</pallas_src>

<mosaic_0001>
module attributes {stable_mosaic.version = 11 : i64} {
  func.func @_mlp_kernel(%arg0: i32, %arg1: memref<8x64xbf16, #tpu.memory_space<vmem>>, %arg2: memref<64x64xbf16, #tpu.memory_space<vmem>>, %arg3: memref<1x64xf32, #tpu.memory_space<vmem>>, %arg4: memref<64x64xbf16, #tpu.memory_space<vmem>>, %arg5: memref<1x64xf32, #tpu.memory_space<vmem>>, %arg6: memref<64x128xbf16, #tpu.memory_space<vmem>>, %arg7: memref<1x128xf32, #tpu.memory_space<vmem>>, %arg8: memref<8x128xf32, #tpu.memory_space<vmem>>) attributes {dimension_semantics = [#tpu.dimension_semantics<parallel>], iteration_bounds = array<i64: 1>, scalar_prefetch = 0 : i64, scratch_operands = 0 : i64, tpu.core_type = #tpu.core_type<tc>, window_params = [{transform_indices = @transform_0, window_bounds = array<i64: 8, 64>}, {pipeline_mode = #tpu.pipeline_mode<synchronous>, transform_indices = @transform_1, window_bounds = array<i64: 64, 64>}, {pipeline_mode = #tpu.pipeline_mode<synchronous>, transform_indices = @transform_2, window_bounds = array<i64: 1, 64>}, {pipeline_mode = #tpu.pipeline_mode<synchronous>, transform_indices = @transform_3, window_bounds = array<i64: 64, 64>}, {pipeline_mode = #tpu.pipeline_mode<synchronous>, transform_indices = @transform_4, window_bounds = array<i64: 1, 64>}, {pipeline_mode = #tpu.pipeline_mode<synchronous>, transform_indices = @transform_5, window_bounds = array<i64: 64, 128>}, {pipeline_mode = #tpu.pipeline_mode<synchronous>, transform_indices = @transform_6, window_bounds = array<i64: 1, 128>}, {transform_indices = @transform_7, window_bounds = array<i64: 8, 128>}]} {
    %c0 = arith.constant 0 : index
    %c0_0 = arith.constant 0 : index
    %0 = vector.load %arg1[%c0, %c0_0] : memref<8x64xbf16, #tpu.memory_space<vmem>>, vector<8x64xbf16>
    %c0_1 = arith.constant 0 : index
    %c0_2 = arith.constant 0 : index
    %1 = vector.load %arg2[%c0_1, %c0_2] : memref<64x64xbf16, #tpu.memory_space<vmem>>, vector<64x64xbf16>
    %cst = arith.constant dense<0.000000e+00> : vector<8x64xf32>
    %2 = tpu.matmul %0, %1, %cst {dimension_numbers = #tpu.dot_dimension_numbers<[1], [0], [0], [1], [0, 0, 1, 1], [], []>} : vector<8x64xbf16>, vector<64x64xbf16>, vector<8x64xf32> -> vector<8x64xf32>
    %c0_3 = arith.constant 0 : index
    %c0_4 = arith.constant 0 : index
    %3 = vector.load %arg3[%c0_3, %c0_4] : memref<1x64xf32, #tpu.memory_space<vmem>>, vector<1x64xf32>
    %4 = vector.broadcast %3 : vector<1x64xf32> to vector<8x64xf32>
    %5 = arith.addf %2, %4 : vector<8x64xf32>
    %cst_5 = arith.constant 0.000000e+00 : f32
    %6 = vector.broadcast %cst_5 : f32 to vector<8x64xf32>
    %7 = arith.maximumf %5, %6 : vector<8x64xf32>
    %8 = arith.truncf %7 : vector<8x64xf32> to vector<8x64xbf16>
    %c0_6 = arith.constant 0 : index
    %c0_7 = arith.constant 0 : index
    %9 = vector.load %arg4[%c0_6, %c0_7] : memref<64x64xbf16, #tpu.memory_space<vmem>>, vector<64x64xbf16>
    %cst_8 = arith.constant dense<0.000000e+00> : vector<8x64xf32>
    %10 = tpu.matmul %8, %9, %cst_8 {dimension_numbers = #tpu.dot_dimension_numbers<[1], [0], [0], [1], [0, 0, 1, 1], [], []>} : vector<8x64xbf16>, vector<64x64xbf16>, vector<8x64xf32> -> vector<8x64xf32>
    %c0_9 = arith.constant 0 : index
    %c0_10 = arith.constant 0 : index
    %11 = vector.load %arg5[%c0_9, %c0_10] : memref<1x64xf32, #tpu.memory_space<vmem>>, vector<1x64xf32>
    %12 = vector.broadcast %11 : vector<1x64xf32> to vector<8x64xf32>
    %13 = arith.addf %10, %12 : vector<8x64xf32>
    %cst_11 = arith.constant 0.000000e+00 : f32
    %14 = vector.broadcast %cst_11 : f32 to vector<8x64xf32>
    %15 = arith.maximumf %13, %14 : vector<8x64xf32>
    %16 = arith.truncf %15 : vector<8x64xf32> to vector<8x64xbf16>
    %c0_12 = arith.constant 0 : index
    %c0_13 = arith.constant 0 : index
    %17 = vector.load %arg6[%c0_12, %c0_13] : memref<64x128xbf16, #tpu.memory_space<vmem>>, vector<64x128xbf16>
    %cst_14 = arith.constant dense<0.000000e+00> : vector<8x128xf32>
    %18 = tpu.matmul %16, %17, %cst_14 {dimension_numbers = #tpu.dot_dimension_numbers<[1], [0], [0], [1], [0, 0, 1, 1], [], []>} : vector<8x64xbf16>, vector<64x128xbf16>, vector<8x128xf32> -> vector<8x128xf32>
    %c0_15 = arith.constant 0 : index
    %c0_16 = arith.constant 0 : index
    %19 = vector.load %arg7[%c0_15, %c0_16] : memref<1x128xf32, #tpu.memory_space<vmem>>, vector<1x128xf32>
    %20 = vector.broadcast %19 : vector<1x128xf32> to vector<8x128xf32>
    %21 = arith.addf %18, %20 : vector<8x128xf32>
    %cst_17 = arith.constant 0.000000e+00 : f32
    %22 = vector.broadcast %cst_17 : f32 to vector<8x128xf32>
    %23 = arith.maximumf %21, %22 : vector<8x128xf32>
    %c0_18 = arith.constant 0 : index
    %c0_19 = arith.constant 0 : index
    %24 = vector.load %arg8[%c0_18, %c0_19] : memref<8x128xf32, #tpu.memory_space<vmem>>, vector<8x128xf32>
    tpu.vector_store %arg8[%c0_18, %c0_19], %23 {strides = array<i32>} : memref<8x128xf32, #tpu.memory_space<vmem>>, vector<8x128xf32>,
    return
  }
  func.func @transform_0(%arg0: i32) -> (i32, i32) {
    %c0_i32 = arith.constant 0 : i32
    %c0_i32_0 = arith.constant 0 : i32
    return %arg0, %c0_i32 : i32, i32
  }
  func.func @transform_1(%arg0: i32) -> (i32, i32) {
    %c0_i32 = arith.constant 0 : i32
    %c0_i32_0 = arith.constant 0 : i32
    %c0_i32_1 = arith.constant 0 : i32
    return %c0_i32, %c0_i32_0 : i32, i32
  }
  func.func @transform_2(%arg0: i32) -> (i32, i32) {
    %c0_i32 = arith.constant 0 : i32
    %c0_i32_0 = arith.constant 0 : i32
    %c0_i32_1 = arith.constant 0 : i32
    return %c0_i32, %c0_i32_0 : i32, i32
  }
  func.func @transform_3(%arg0: i32) -> (i32, i32) {
    %c0_i32 = arith.constant 0 : i32
    %c0_i32_0 = arith.constant 0 : i32
    %c0_i32_1 = arith.constant 0 : i32
    return %c0_i32, %c0_i32_0 : i32, i32
  }
  func.func @transform_4(%arg0: i32) -> (i32, i32) {
    %c0_i32 = arith.constant 0 : i32
    %c0_i32_0 = arith.constant 0 : i32
    %c0_i32_1 = arith.constant 0 : i32
    return %c0_i32, %c0_i32_0 : i32, i32
  }
  func.func @transform_5(%arg0: i32) -> (i32, i32) {
    %c0_i32 = arith.constant 0 : i32
    %c0_i32_0 = arith.constant 0 : i32
    %c0_i32_1 = arith.constant 0 : i32
    return %c0_i32, %c0_i32_0 : i32, i32
  }
  func.func @transform_6(%arg0: i32) -> (i32, i32) {
    %c0_i32 = arith.constant 0 : i32
    %c0_i32_0 = arith.constant 0 : i32
    %c0_i32_1 = arith.constant 0 : i32
    return %c0_i32, %c0_i32_0 : i32, i32
  }
  func.func @transform_7(%arg0: i32) -> (i32, i32) {
    %c0_i32 = arith.constant 0 : i32
    %c0_i32_0 = arith.constant 0 : i32
    return %arg0, %c0_i32 : i32, i32
  }
}

</mosaic_0001>

<bundles_post_ra>
// kernel: tpu_custom_call.1
= control target key start
LH: loop header
LB: loop body
LE: loop exit
PB: predicated region body
PF: predicated region fallthrough
CT: control target
= control target key end

     0   :  { %12 = vsyncpa [#allocation3], 0  ;;  %s547_s0 = inlined_call_operand.hbm [shape: bf16[8,64], index: 0, kind: input, shape index: {}]   ;;  %s548_s1 = inlined_call_operand.hbm [shape: bf16[64,64], index: 1, kind: input, shape index: {}]   ;;  %s549_s2 = inlined_call_operand.vmem [shape: f32[1,64], index: 2, kind: input, shape index: {}]   ;;  %s550_s3 = inlined_call_operand.hbm [shape: bf16[64,64], index: 3, kind: input, shape index: {}]   ;;  %s551_s4 = inlined_call_operand.vmem [shape: f32[1,64], index: 4, kind: input, shape index: {}]   ;;  %s552_s5 = inlined_call_operand.hbm [shape: bf16[64,128], index: 5, kind: input, shape index: {}]   ;;  %s553_s6 = inlined_call_operand.vmem [shape: f32[1,128], index: 6, kind: input, shape index: {}]   ;;  %s554_s7 = inlined_call_operand.hbm [shape: f32[8,128], index: 7, kind: output, shape index: {}]  }
   0x1   :  { %13 = vsyncpa [#allocation6], 0 }
   0x2   :  { %14 = vsyncpa [#allocation9], 0  ;;  %s31_s26 = sshll.u32 %s548_s1, 4  ;;  %s32_s26 = int_to_ptr.hbm [resolvable:$true] %s31_s26 }
   0x3   :  { %15 = vsyncpa [#allocation4], 0  ;;  %s473_s27 = smov [#allocation5]   ;;  %s21_s8 = sshll.u32 %s547_s0, 4  ;;  %s22_s8 = int_to_ptr.hbm [resolvable:$true] %s21_s8 }
   0x4   :  { %s33_s28 = sshll.u32 %s473_s27, 4  ;;  %s474_s9 = smov 64   ;;  %s34_s28 = int_to_ptr.vmem [resolvable:$true] %s33_s28 }
   0x5   :  { %s475_s10 = smov 4   ;;  %s476_s11 = smov [#allocation2]  }
   0x6   :  { %39 = dma.hbm_to_vmem [thread:$0]  %s32_s26, 512, %s34_s28, [#allocation6], %s474_s9, %s474_s9, %s475_s10  }
   0x7   :  { %s23_s12 = sshll.u32 %s476_s11, 4  ;;  %s46_s15 = sshll.u32 %s550_s3, 4  ;;  %s24_s12 = int_to_ptr.vmem [resolvable:$true] %s23_s12  ;;  %s47_s15 = int_to_ptr.hbm [resolvable:$true] %s46_s15 }
   0x8   :  { %26 = dma.hbm_to_vmem [thread:$0]  %s22_s8, 64, %s24_s12, [#allocation3]  }
   0x9   :  { %s61_s17 = sshll.u32 %s552_s5, 4  ;;  %s477_s18 = smov [#allocation7]   ;;  %s62_s17 = int_to_ptr.hbm [resolvable:$true] %s61_s17 }
   0xa   :  { %s48_s19 = sshll.u32 %s477_s18, 4  ;;  %s478_s0 = smov [#allocation8]   ;;  %s49_s19 = int_to_ptr.vmem [resolvable:$true] %s48_s19 }
   0xb   :  { %54 = dma.hbm_to_vmem [thread:$0]  %s47_s15, 512, %s49_s19, [#allocation6], %s474_s9, %s474_s9, %s475_s10  }
   0xc   :  { %s63_s20 = sshll.u32 %s478_s0, 4  ;;  %s64_s20 = int_to_ptr.vmem [resolvable:$true] %s63_s20 }
   0xd   :  { %69 = dma.hbm_to_vmem [thread:$0]  %s62_s17, 512, %s64_s20, [#allocation9], %s474_s9, %s474_s9, %s475_s10  }
   0xe   :  { %465 = dma.done.wait [#allocation3], 64  }
   0xf   :  { %466 = vsyncadd [#allocation3], 4294967232 }
  0x10   :  { %467 = dma.done.wait [#allocation6], 1024  }
  0x11   :  { %468 = vsyncadd [#allocation6], 4294966272 }
  0x12   :  { %469 = dma.done.wait [#allocation9], 512  }
  0x13   :  { %470 = vsyncadd [#allocation9], 4294966784  ;;  %v326_v0 = vld [vmem:[#allocation5 + $0x18] sm:$0xff]  ;;  %v325_v2 = vld [vmem:[#allocation5 + $0x10] sm:$0xff]  ;;  %vm126_vm0 = vcmask 523264   ;;  %s479_s24 = smov [#allocation10]  }
  0x14   :  { %v330_v1 = vld [vmem:[#allocation7 + $0x18] sm:$0xff]  ;;  %134 = vmatpush.bf16.msra.mxu0 %v326_v0  ;;  %v329_v3 = vld [vmem:[#allocation7 + $0x10] sm:$0xff]  ;;  %v324_v4 = vld [vmem:[#allocation5 + $0x8] sm:$0xff]  ;;  %s258_s25 = sshll.u32 %s479_s24, 4  ;;  %s260_s28 = sshll.u32 %s554_s7, 4  ;;  %s259_s25 = int_to_ptr.vmem [resolvable:$true] %s258_s25  ;;  %s261_s28 = int_to_ptr.hbm [resolvable:$true] %s260_s28 }
  0x15   :  { %188 = vmatpush.bf16.msra.mxu1 %v330_v1  ;;  %v323_v5 = vld [vmem:[#allocation5] sm:$0xff]  ;;  %v89_v6 = vld [vmem:[#allocation2] sm:$0xf]  ;;  %v328_v7 = vld [vmem:[#allocation7 + $0x8] sm:$0xff] }
  0x16   :  { %v327_v8 = vld [vmem:[#allocation7] sm:$0xff]  ;;  %v334_v9 = vld [vmem:[#allocation8 + $0x18] sm:$0xff]  ;;  %v333_v10 = vld [vmem:[#allocation8 + $0x10] sm:$0xff] }
  0x17   :  { %242 = vmatpush.bf16.msra.mxu2 %v334_v9  ;;  %v342_v11 = vld [vmem:[%s549_s2] ss:$0 sm:$0xff]  ;;  %v332_v17 = vld [vmem:[#allocation8 + $0x8] sm:$0xff]  ;;  %v331_v18 = vld [vmem:[#allocation8] sm:$0xff] }
  0x18   :  { %135 = vmatpush.bf16.msra.mxu0 %v325_v2  ;;  %v343_v19 = vld [vmem:[%s551_s4] ss:$0 sm:$0xff] }
  0x19   :  { %189 = vmatpush.bf16.msra.mxu1 %v329_v3  ;;  %v344_v25 = vld [vmem:[%s553_s6] ss:$0 sm:$0xff] }
  0x1b   :  { %243 = vmatpush.bf16.msra.mxu2 %v333_v10 }
  0x1c   :  { %136 = vmatpush.bf16.msra.mxu0 %v324_v4 }
  0x1d   :  { %190 = vmatpush.bf16.msra.mxu1 %v328_v7 }
  0x1f   :  { %244 = vmatpush.bf16.msra.mxu2 %v332_v17 }
  0x20   :  { %137 = vmatpush.bf16.msra.mxu0 %v323_v5 }
  0x21   :  { %191 = vmatpush.bf16.msra.mxu1 %v327_v8 }
  0x23   :  { %288 = vmatmul.msk.bf16.vlgmr.msra.gmra.mxu0 %vm126_vm0, %v89_v6  ;;  %245 = vmatpush.bf16.msra.mxu2 %v331_v18 }
  0xa0   :  { %v139_v12 = vpop.f32.mrf.mxu0 }
  0xa1   :  { %v140_v13 = vadd.f32 %v342_v11, %v139_v12 }
  0xa3   :  { %v143_v14 = vmax.f32 %v140_v13, 0.0 }
  0xa5   :  { %v144_v15 = vpack.c.bf16 %v143_v14, %v143_v14 }
  0xa7   :  { %305 = vmatmul.msk.bf16.vlgmr.msra.gmra.mxu1 %vm126_vm0, %v144_v15 }
  0xa8   :  { %v141_v16 = vpop.f32.mrf.mxu0 }
 0x124   :  { %v193_v20 = vpop.f32.mrf.mxu1 }
 0x125   :  { %v194_v21 = vadd.f32 %v343_v19, %v193_v20 }
 0x127   :  { %v197_v22 = vmax.f32 %v194_v21, 0.0 }
 0x129   :  { %v198_v23 = vpack.c.bf16 %v197_v22, %v197_v22 }
 0x12b   :  { %322 = vmatmul.msk.bf16.vlgmr.msra.gmra.mxu2 %vm126_vm0, %v198_v23 }
 0x12c   :  { %v195_v24 = vpop.f32.mrf.mxu1 }
 0x1ae   :  { %v247_v26 = vpop.f32.mrf.mxu2 }
 0x1af   :  { %v248_v27 = vadd.f32 %v344_v25, %v247_v26 }
 0x1b1   :  { %v251_v28 = vmax.f32 %v248_v27, 0.0 }
 0x1b3   :  { %252 = vst [vmem:[#allocation10] sm:$0xff] %v251_v28 }
 0x1b4   :  { %263 = dma.vmem_to_hbm [thread:$0]  %s259_s25, 128, %s261_s28, [#allocation4]  }
 0x1b6   :  { %v249_v29 = vpop.f32.mrf.mxu2 }
 0x1b7   :  { %471 = dma.done.wait [#allocation4], 128  }
 0x1b8   :  { %472 = vsyncadd [#allocation4], 4294967168 }
 0x1b9   :  { %268 = vsyncpa [#allocation3], 1 }
 0x1ba   :  { %269 = vsyncpa [#allocation6], 1 }
 0x1bb   :  { %270 = vsyncpa [#allocation9], 1 }
 0x1bc   :  { %271 = vsyncpa [#allocation4], 1 }

</bundles_post_ra>
